<compile_context>
chip_gen: v7x
topology: tpu7x:2x2x1
jax: 0.10.0
libtpu: 0.0.40
codegen_flags: <defaults>
</compile_context>

<pallas_src>
import functools

import jax
import jax.numpy as jnp
from jax.experimental import pallas as pl
from jax.experimental.pallas import tpu as pltpu

_SQRT2_INV = 0.7071067811865476
_INV_1414 = 1.0 / 1.414


def _leaky_relu(v):
    # nn.LeakyReLU default negative_slope = 0.01
    return jnp.where(v >= 0, v, 0.01 * v)


def _erf(v):
    # Abramowitz & Stegun 7.1.26 rational approximation (|err| <= 1.5e-7, i.e.
    # at f32 epsilon). Built from exp / mul / add / where so it lowers in Mosaic.
    a1, a2, a3, a4, a5 = (0.254829592, -0.284496736, 1.421413741,
                          -1.453152027, 1.061405429)
    p = 0.3275911
    s = jnp.where(v >= 0, 1.0, -1.0)
    a = jnp.abs(v)
    tt = 1.0 / (1.0 + p * a)
    poly = tt * (a1 + tt * (a2 + tt * (a3 + tt * (a4 + tt * a5))))
    return s * (1.0 - poly * jnp.exp(-a * a))


def _gelu(v):
    # exact (erf) GELU, matching nn.GELU(approximate='none')
    return 0.5 * v * (1.0 + _erf(v * _SQRT2_INV))


# ----------------------------------------------------------------------------
# Kernel
# ----------------------------------------------------------------------------
def _fc_kernel(xyt_ref, w_embxy, b_embxy, wt1, w1xy, w1t, c123,
               w2h, w2yt, w3h, w3yt, w4h, w4yt, b4, o_ref,
               *, t_col, mm_dtype):
    f32 = jnp.float32
    xyt = xyt_ref[...].astype(f32)            # (tb, x_dim+y_dim+1)
    xyt_mm = xyt.astype(mm_dtype)             # matmul-operand dtype (no-op if f32)
    t = xyt[:, t_col:t_col + 1]               # (tb, 1)

    def mm(a, w_ref):
        return jnp.dot(a.astype(mm_dtype), w_ref[...], preferred_element_type=f32)

    # x/y embedding first Linears, merged into one block-diagonal matmul.
    a_xy = _leaky_relu(mm(xyt_mm, w_embxy) + b_embxy[...])       # (tb, 2*emb)
    # TimeSiren first Linear has in_features=1 -> VPU broadcast multiply.
    a_t = jnp.sin(t * wt1[...])                                  # (tb, emb)

    # fc1 (embed second Linears, x-negation and BatchNorm folded in offline).
    nn1 = _gelu(mm(a_xy, w1xy) + mm(a_t, w1t) + c123[0:1, :])

    # fc2 (BN folded); y|t contribution via zero-padded full-xyt weight.
    r1 = nn1 * _INV_1414
    nn2 = _gelu(mm(r1, w2h) + mm(xyt_mm, w2yt) + c123[1:2, :]) + r1

    # fc3
    r2 = nn2 * _INV_1414
    nn3 = _gelu(mm(r2, w3h) + mm(xyt_mm, w3yt) + c123[2:3, :]) + r2

    # fc4 (output columns zero-padded to a lane-dense width).
    out = mm(nn3, w4h) + mm(xyt_mm, w4yt) + b4[...]
    o_ref[...] = out.astype(o_ref.dtype)


# ----------------------------------------------------------------------------
# Offline weight folding (PyTorch-layout params -> kernel operands)
# ----------------------------------------------------------------------------
def fold_fc_params(p, *, eps=1e-5, mm_dtype=jnp.float32):
    """Fold eval-mode BN and the embedding second Linears into the fc weights."""
    f32 = jnp.float32
    g = lambda k: jnp.asarray(p[k], f32)

    Wx1, bx1, Wx2, bx2 = g("Wx1"), g("bx1"), g("Wx2"), g("bx2")
    Wy1, by1, Wy2, by2 = g("Wy1"), g("by1"), g("Wy2"), g("by2")
    Wt1, Wt2, bt2 = g("Wt1"), g("Wt2"), g("bt2")
    Wf1, bf1 = g("Wf1"), g("bf1")
    Wf2, bf2 = g("Wf2"), g("bf2")
    Wf3, bf3 = g("Wf3"), g("bf3")
    Wf4, bf4 = g("Wf4"), g("bf4")

    emb = Wx1.shape[0]
    x_dim = Wx1.shape[1]
    y_dim = Wy1.shape[1]
    nh = Wf1.shape[0]
    out_dim = Wf4.shape[0]
    d_in = x_dim + y_dim + 1

    def bn_scale_shift(i):
        s = g(f"gamma{i}") / jnp.sqrt(g(f"var{i}") + eps)
        h = g(f"beta{i}") - g(f"mean{i}") * s
        return s, h

    s1, h1 = bn_scale_shift(1)
    s2, h2 = bn_scale_shift(2)
    s3, h3 = bn_scale_shift(3)

    # --- embedding first Linears: block-diagonal over [x | y] ----------------
    w_embxy = jnp.zeros((d_in, 2 * emb), f32)
    w_embxy = w_embxy.at[:x_dim, :emb].set(Wx1.T)
    w_embxy = w_embxy.at[x_dim:x_dim + y_dim, emb:].set(Wy1.T)
    b_embxy = jnp.concatenate([bx1, by1]).reshape(1, 2 * emb)
    wt1 = Wt1.T.reshape(1, emb)                 # TimeSiren lin1 (no bias)

    # --- fc1: fold embed second Linears + x-negation + BN --------------------
    wf1x = Wf1.T[:emb]
    wf1y = Wf1.T[emb:2 * emb]
    wf1t = Wf1.T[2 * emb:]
    w1xy = jnp.concatenate([-(Wx2.T @ wf1x), Wy2.T @ wf1y], axis=0) * s1[None, :]
    w1t = (Wt2.T @ wf1t) * s1[None, :]
    c1 = (bf1 - bx2 @ wf1x + by2 @ wf1y + bt2 @ wf1t) * s1 + h1

    # --- fc2 / fc3: BN fold; y|t columns as zero-padded full-xyt weights -----
    def mid(Wf, bf, s, h):
        wh = Wf.T[:nh] * s[None, :]
        wyt = jnp.zeros((d_in, nh), f32).at[x_dim:].set(Wf.T[nh:]) * s[None, :]
        c = bf * s + h
        return wh, wyt, c

    w2h, w2yt, c2 = mid(Wf2, bf2, s2, h2)
    w3h, w3yt, c3 = mid(Wf3, bf3, s3, h3)

    # --- fc4: pad output width to a lane-dense multiple of 128 ---------------
    out_pad = ((out_dim + 127) // 128) * 128
    w4h = jnp.zeros((nh, out_pad), f32).at[:, :out_dim].set(Wf4.T[:nh])
    w4yt = jnp.zeros((d_in, out_pad), f32).at[x_dim:, :out_dim].set(Wf4.T[nh:])
    b4 = jnp.zeros((1, out_pad), f32).at[0, :out_dim].set(bf4)

    c123 = jnp.stack([c1, c2, c3], axis=0)      # (3, nh) bias pack

    cast = lambda w: w.astype(mm_dtype)
    return dict(
        w_embxy=cast(w_embxy), b_embxy=b_embxy, wt1=wt1,
        w1xy=cast(w1xy), w1t=cast(w1t), c123=c123,
        w2h=cast(w2h), w2yt=cast(w2yt),
        w3h=cast(w3h), w3yt=cast(w3yt),
        w4h=cast(w4h), w4yt=cast(w4yt), b4=b4,
        out_dim=out_dim, emb=emb, nh=nh,
    )


_WEIGHT_ORDER = ("w_embxy", "b_embxy", "wt1", "w1xy", "w1t", "c123",
                 "w2h", "w2yt", "w3h", "w3yt", "w4h", "w4yt", "b4")
_MATMUL_WEIGHTS = ("w_embxy", "w1xy", "w1t", "w2h", "w2yt", "w3h", "w3yt",
                   "w4h", "w4yt")


def _pick_tb(B, cap=512):
    """Largest multiple-of-8 divisor of B that is <= cap AND leaves >= 2 grid
    steps (so both v7x TensorCores get work); fall back to B otherwise."""
    best = 0
    d = 8
    limit = min(cap, B // 2)
    while d <= limit:
        if B % d == 0:
            best = d
        d += 8
    return best if best else B


# ----------------------------------------------------------------------------
# Wrapper
# ----------------------------------------------------------------------------
def model_mlp_diff_fc_forward(y, x, t, folded, *, tb=None):
    """y:(B,y_dim) x:(B,x_dim) t:(B,1); folded: dict from fold_fc_params."""
    B = y.shape[0]
    xyt = jnp.concatenate([x, y, t], axis=1).astype(jnp.float32)   # (B, d_in)
    d_in = xyt.shape[1]
    out_dim = folded["out_dim"]
    emb, nh = folded["emb"], folded["nh"]
    out_pad = folded["b4"].shape[1]

    wlist = [folded[k] for k in _WEIGHT_ORDER]
    mm_dtype = jnp.dtype(folded["w1xy"].dtype)

    if tb is None:
        tb = _pick_tb(B)
    assert B % tb == 0, "batch must be divisible by the batch tile"
    nb = B // tb

    kern = functools.partial(_fc_kernel, t_col=d_in - 1, mm_dtype=mm_dtype)

    in_specs = (
        [pl.BlockSpec((tb, d_in), lambda i: (i, 0))]
        # weights: full arrays, VMEM-resident across all grid steps
        + [pl.BlockSpec(w.shape, lambda i: (0, 0)) for w in wlist]
    )
    out_specs = pl.BlockSpec((tb, out_pad), lambda i: (i, 0))

    # Advisory cost estimate so XLA schedules this small custom call sensibly.
    flops = 2 * B * sum(int(folded[k].shape[0]) * int(folded[k].shape[1])
                        for k in _MATMUL_WEIGHTS)
    wbytes = sum(int(w.size) * w.dtype.itemsize for w in wlist)
    io_bytes = int(xyt.size) * 4 + B * out_pad * 4
    cost = pl.CostEstimate(flops=int(flops),
                           transcendentals=int(B * (emb + 3 * nh)),
                           bytes_accessed=int(wbytes + io_bytes))

    out_padded = pl.pallas_call(
        kern,
        out_shape=jax.ShapeDtypeStruct((B, out_pad), y.dtype),
        grid=(nb,),
        in_specs=in_specs,
        out_specs=out_specs,
        compiler_params=pltpu.CompilerParams(
            dimension_semantics=("parallel",),
        ),
        cost_estimate=cost,
    )(xyt, *wlist)

    return out_padded[:, :out_dim]


# ----------------------------------------------------------------------------
# Demo / correctness check
# ----------------------------------------------------------------------------
if __name__ == "__main__":
    # Small shapes consistent with the module: x_dim=4, y_dim=3, embed_dim=32,
    # n_hidden=32, output_dim=y_dim, batch=16 (auto-tiled 2 x 8 over the grid).
    B, x_dim, y_dim = 16, 4, 3
    emb, nh = 32, 32
    out_dim = y_dim
    eps = 1e-5

    keys = iter(jax.random.split(jax.random.PRNGKey(0), 64))
    nrm = lambda shape, scale=0.1: jax.random.normal(next(keys), shape, jnp.float32) * scale

    # data
    x = nrm((B, x_dim), 1.0)
    y = nrm((B, y_dim), 1.0)
    t = jax.random.uniform(next(keys), (B, 1), jnp.float32)

    # PyTorch-layout parameters (Linear weight is (out, in))
    params = dict(
        Wx1=nrm((emb, x_dim)), bx1=nrm((emb,)),
        Wx2=nrm((emb, emb)), bx2=nrm((emb,)),
        Wy1=nrm((emb, y_dim)), by1=nrm((emb,)),
        Wy2=nrm((emb, emb)), by2=nrm((emb,)),
        Wt1=nrm((emb, 1), 1.0),                       # TimeSiren lin1 (no bias)
        Wt2=nrm((emb, emb)), bt2=nrm((emb,)),
        Wf1=nrm((nh, 3 * emb)), bf1=nrm((nh,)),
        Wf2=nrm((nh, nh + y_dim + 1)), bf2=nrm((nh,)),
        Wf3=nrm((nh, nh + y_dim + 1)), bf3=nrm((nh,)),
        Wf4=nrm((out_dim, nh + y_dim + 1)), bf4=nrm((out_dim,)),
    )
    for i in (1, 2, 3):                               # BatchNorm1d running stats
        params[f"gamma{i}"] = 1.0 + nrm((nh,))
        params[f"beta{i}"] = nrm((nh,))
        params[f"mean{i}"] = nrm((nh,))
        params[f"var{i}"] = 0.5 + jax.random.uniform(next(keys), (nh,), jnp.float32)

    # Pure-JAX reference matching the PyTorch module (eval-mode BatchNorm).
    def ref_forward(p):
        lrelu = lambda v: jnp.where(v >= 0, v, 0.01 * v)
        gelu = lambda v: 0.5 * v * (1.0 + jax.lax.erf(v * _SQRT2_INV))

        def bn(v, i):
            s = p[f"gamma{i}"] / jnp.sqrt(p[f"var{i}"] + eps)
            return (v - p[f"mean{i}"]) * s + p[f"beta{i}"]

        x_e = lrelu(x @ p["Wx1"].T + p["bx1"]) @ p["Wx2"].T + p["bx2"]
        x_e = -x_e
        y_e = lrelu(y @ p["Wy1"].T + p["by1"]) @ p["Wy2"].T + p["by2"]
        t_e = jnp.sin(t @ p["Wt1"].T) @ p["Wt2"].T + p["bt2"]
        ni = jnp.concatenate([x_e, y_e, t_e], axis=1)
        nn1 = gelu(bn(ni @ p["Wf1"].T + p["bf1"], 1))
        c2 = jnp.concatenate([nn1 / 1.414, y, t], axis=1)
        nn2 = gelu(bn(c2 @ p["Wf2"].T + p["bf2"], 2)) + nn1 / 1.414
        c3 = jnp.concatenate([nn2 / 1.414, y, t], axis=1)
        nn3 = gelu(bn(c3 @ p["Wf3"].T + p["bf3"], 3)) + nn2 / 1.414
        c4 = jnp.concatenate([nn3, y, t], axis=1)
        return c4 @ p["Wf4"].T + p["bf4"]

    ref = ref_forward(params)

    # f32 matmul path (exact-semantics check)
    folded_f32 = fold_fc_params(params, eps=eps, mm_dtype=jnp.float32)
    out = jax.block_until_ready(model_mlp_diff_fc_forward(y, x, t, folded_f32))
    assert out.shape == (B, out_dim)
    assert jnp.allclose(out, ref, atol=1e-4, rtol=1e-4), \
        float(jnp.max(jnp.abs(out - ref)))

    # bf16 matmul-operand path (v6e/v7x MXU fast path; f32 accumulate/elementwise)
    folded_bf16 = fold_fc_params(params, eps=eps, mm_dtype=jnp.bfloat16)
    out_bf = jax.block_until_ready(model_mlp_diff_fc_forward(y, x, t, folded_bf16))
    assert out_bf.shape == (B, out_dim)
    assert float(jnp.max(jnp.abs(out_bf - ref))) < 0.2

    print("KERNEL_OK")
</pallas_src>

<mosaic_0001>
module attributes {stable_mosaic.version = 11 : i64} {
  func.func @_fc_kernel(%arg0: i32, %arg1: memref<8x8xf32, #tpu.memory_space<vmem>>, %arg2: memref<8x64xf32, #tpu.memory_space<vmem>>, %arg3: memref<1x64xf32, #tpu.memory_space<vmem>>, %arg4: memref<1x32xf32, #tpu.memory_space<vmem>>, %arg5: memref<64x32xf32, #tpu.memory_space<vmem>>, %arg6: memref<32x32xf32, #tpu.memory_space<vmem>>, %arg7: memref<3x32xf32, #tpu.memory_space<vmem>>, %arg8: memref<32x32xf32, #tpu.memory_space<vmem>>, %arg9: memref<8x32xf32, #tpu.memory_space<vmem>>, %arg10: memref<32x32xf32, #tpu.memory_space<vmem>>, %arg11: memref<8x32xf32, #tpu.memory_space<vmem>>, %arg12: memref<32x128xf32, #tpu.memory_space<vmem>>, %arg13: memref<8x128xf32, #tpu.memory_space<vmem>>, %arg14: memref<1x128xf32, #tpu.memory_space<vmem>>, %arg15: memref<8x128xf32, #tpu.memory_space<vmem>>) attributes {dimension_semantics = [#tpu.dimension_semantics<parallel>], iteration_bounds = array<i64: 2>, scalar_prefetch = 0 : i64, scratch_operands = 0 : i64, tpu.core_type = #tpu.core_type<tc>, window_params = [{transform_indices = @transform_0, window_bounds = array<i64: 8, 8>}, {pipeline_mode = #tpu.pipeline_mode<synchronous>, transform_indices = @transform_1, window_bounds = array<i64: 8, 64>}, {pipeline_mode = #tpu.pipeline_mode<synchronous>, transform_indices = @transform_2, window_bounds = array<i64: 1, 64>}, {pipeline_mode = #tpu.pipeline_mode<synchronous>, transform_indices = @transform_3, window_bounds = array<i64: 1, 32>}, {pipeline_mode = #tpu.pipeline_mode<synchronous>, transform_indices = @transform_4, window_bounds = array<i64: 64, 32>}, {pipeline_mode = #tpu.pipeline_mode<synchronous>, transform_indices = @transform_5, window_bounds = array<i64: 32, 32>}, {pipeline_mode = #tpu.pipeline_mode<synchronous>, transform_indices = @transform_6, window_bounds = array<i64: 3, 32>}, {pipeline_mode = #tpu.pipeline_mode<synchronous>, transform_indices = @transform_7, window_bounds = array<i64: 32, 32>}, {pipeline_mode = #tpu.pipeline_mode<synchronous>, transform_indices = @transform_8, window_bounds = array<i64: 8, 32>}, {pipeline_mode = #tpu.pipeline_mode<synchronous>, transform_indices = @transform_9, window_bounds = array<i64: 32, 32>}, {pipeline_mode = #tpu.pipeline_mode<synchronous>, transform_indices = @transform_10, window_bounds = array<i64: 8, 32>}, {pipeline_mode = #tpu.pipeline_mode<synchronous>, transform_indices = @transform_11, window_bounds = array<i64: 32, 128>}, {pipeline_mode = #tpu.pipeline_mode<synchronous>, transform_indices = @transform_12, window_bounds = array<i64: 8, 128>}, {pipeline_mode = #tpu.pipeline_mode<synchronous>, transform_indices = @transform_13, window_bounds = array<i64: 1, 128>}, {transform_indices = @transform_14, window_bounds = array<i64: 8, 128>}]} {
    %c0 = arith.constant 0 : index
    %c0_0 = arith.constant 0 : index
    %0 = vector.load %arg1[%c0, %c0_0] : memref<8x8xf32, #tpu.memory_space<vmem>>, vector<8x8xf32>
    %1 = vector.extract_strided_slice %0 {offsets = [0, 7], sizes = [8, 1], strides = [1, 1]} : vector<8x8xf32> to vector<8x1xf32>
    %c0_1 = arith.constant 0 : index
    %c0_2 = arith.constant 0 : index
    %2 = vector.load %arg2[%c0_1, %c0_2] : memref<8x64xf32, #tpu.memory_space<vmem>>, vector<8x64xf32>
    %cst = arith.constant dense<0.000000e+00> : vector<8x64xf32>
    %3 = tpu.matmul %0, %2, %cst {dimension_numbers = #tpu.dot_dimension_numbers<[1], [0], [0], [1], [0, 0, 1, 1], [], []>} : vector<8x8xf32>, vector<8x64xf32>, vector<8x64xf32> -> vector<8x64xf32>
    %c0_3 = arith.constant 0 : index
    %c0_4 = arith.constant 0 : index
    %4 = vector.load %arg3[%c0_3, %c0_4] : memref<1x64xf32, #tpu.memory_space<vmem>>, vector<1x64xf32>
    %5 = vector.broadcast %4 : vector<1x64xf32> to vector<8x64xf32>
    %6 = arith.addf %3, %5 : vector<8x64xf32>
    %cst_5 = arith.constant 0.000000e+00 : f32
    %7 = vector.broadcast %cst_5 : f32 to vector<8x64xf32>
    %8 = arith.cmpf oge, %6, %7 : vector<8x64xf32>
    %cst_6 = arith.constant 0.00999999977 : f32
    %9 = vector.broadcast %cst_6 : f32 to vector<8x64xf32>
    %10 = arith.mulf %9, %6 : vector<8x64xf32>
    %11 = arith.select %8, %6, %10 : vector<8x64xi1>, vector<8x64xf32>
    %c0_7 = arith.constant 0 : index
    %c0_8 = arith.constant 0 : index
    %12 = vector.load %arg4[%c0_7, %c0_8] : memref<1x32xf32, #tpu.memory_space<vmem>>, vector<1x32xf32>
    %13 = vector.broadcast %1 : vector<8x1xf32> to vector<8x32xf32>
    %14 = vector.broadcast %12 : vector<1x32xf32> to vector<8x32xf32>
    %15 = arith.mulf %13, %14 : vector<8x32xf32>
    %16 = math.sin %15 : vector<8x32xf32>
    %c0_9 = arith.constant 0 : index
    %c0_10 = arith.constant 0 : index
    %17 = vector.load %arg5[%c0_9, %c0_10] : memref<64x32xf32, #tpu.memory_space<vmem>>, vector<64x32xf32>
    %cst_11 = arith.constant dense<0.000000e+00> : vector<8x32xf32>
    %18 = tpu.matmul %11, %17, %cst_11 {dimension_numbers = #tpu.dot_dimension_numbers<[1], [0], [0], [1], [0, 0, 1, 1], [], []>} : vector<8x64xf32>, vector<64x32xf32>, vector<8x32xf32> -> vector<8x32xf32>
    %c0_12 = arith.constant 0 : index
    %c0_13 = arith.constant 0 : index
    %19 = vector.load %arg6[%c0_12, %c0_13] : memref<32x32xf32, #tpu.memory_space<vmem>>, vector<32x32xf32>
    %cst_14 = arith.constant dense<0.000000e+00> : vector<8x32xf32>
    %20 = tpu.matmul %16, %19, %cst_14 {dimension_numbers = #tpu.dot_dimension_numbers<[1], [0], [0], [1], [0, 0, 1, 1], [], []>} : vector<8x32xf32>, vector<32x32xf32>, vector<8x32xf32> -> vector<8x32xf32>
    %21 = arith.addf %18, %20 : vector<8x32xf32>
    %c0_15 = arith.constant 0 : index
    %c0_16 = arith.constant 0 : index
    %22 = vector.load %arg7[%c0_15, %c0_16] : memref<3x32xf32, #tpu.memory_space<vmem>>, vector<1x32xf32>
    %23 = vector.broadcast %22 : vector<1x32xf32> to vector<8x32xf32>
    %24 = arith.addf %21, %23 : vector<8x32xf32>
    %cst_17 = arith.constant 5.000000e-01 : f32
    %25 = vector.broadcast %cst_17 : f32 to vector<8x32xf32>
    %26 = arith.mulf %25, %24 : vector<8x32xf32>
    %cst_18 = arith.constant 0.707106769 : f32
    %27 = vector.broadcast %cst_18 : f32 to vector<8x32xf32>
    %28 = arith.mulf %24, %27 : vector<8x32xf32>
    %cst_19 = arith.constant 0.000000e+00 : f32
    %29 = vector.broadcast %cst_19 : f32 to vector<8x32xf32>
    %30 = arith.cmpf oge, %28, %29 : vector<8x32xf32>
    %cst_20 = arith.constant 1.000000e+00 : f32
    %cst_21 = arith.constant -1.000000e+00 : f32
    %31 = vector.broadcast %cst_20 : f32 to vector<8x32xf32>
    %32 = vector.broadcast %cst_21 : f32 to vector<8x32xf32>
    %33 = arith.select %30, %31, %32 : vector<8x32xi1>, vector<8x32xf32>
    %34 = math.absf %28 : vector<8x32xf32>
    %cst_22 = arith.constant 0.327591091 : f32
    %35 = vector.broadcast %cst_22 : f32 to vector<8x32xf32>
    %36 = arith.mulf %35, %34 : vector<8x32xf32>
    %cst_23 = arith.constant 1.000000e+00 : f32
    %37 = vector.broadcast %cst_23 : f32 to vector<8x32xf32>
    %38 = arith.addf %37, %36 : vector<8x32xf32>
    %cst_24 = arith.constant 1.000000e+00 : f32
    %39 = vector.broadcast %cst_24 : f32 to vector<8x32xf32>
    %40 = arith.divf %39, %38 : vector<8x32xf32>
    %cst_25 = arith.constant 1.06140542 : f32
    %41 = vector.broadcast %cst_25 : f32 to vector<8x32xf32>
    %42 = arith.mulf %40, %41 : vector<8x32xf32>
    %cst_26 = arith.constant -1.45315206 : f32
    %43 = vector.broadcast %cst_26 : f32 to vector<8x32xf32>
    %44 = arith.addf %43, %42 : vector<8x32xf32>
    %45 = arith.mulf %40, %44 : vector<8x32xf32>
    %cst_27 = arith.constant 1.42141378 : f32
    %46 = vector.broadcast %cst_27 : f32 to vector<8x32xf32>
    %47 = arith.addf %46, %45 : vector<8x32xf32>
    %48 = arith.mulf %40, %47 : vector<8x32xf32>
    %cst_28 = arith.constant -0.284496725 : f32
    %49 = vector.broadcast %cst_28 : f32 to vector<8x32xf32>
    %50 = arith.addf %49, %48 : vector<8x32xf32>
    %51 = arith.mulf %40, %50 : vector<8x32xf32>
    %cst_29 = arith.constant 0.254829586 : f32
    %52 = vector.broadcast %cst_29 : f32 to vector<8x32xf32>
    %53 = arith.addf %52, %51 : vector<8x32xf32>
    %54 = arith.mulf %40, %53 : vector<8x32xf32>
    %cst_30 = arith.constant 0.000000e+00 : f32
    %55 = vector.broadcast %cst_30 : f32 to vector<8x32xf32>
    %56 = arith.subf %55, %34 : vector<8x32xf32>
    %57 = arith.mulf %56, %34 : vector<8x32xf32>
    %58 = math.exp %57 : vector<8x32xf32>
    %59 = arith.mulf %54, %58 : vector<8x32xf32>
    %cst_31 = arith.constant 1.000000e+00 : f32
    %60 = vector.broadcast %cst_31 : f32 to vector<8x32xf32>
    %61 = arith.subf %60, %59 : vector<8x32xf32>
    %62 = arith.mulf %33, %61 : vector<8x32xf32>
    %cst_32 = arith.constant 1.000000e+00 : f32
    %63 = vector.broadcast %cst_32 : f32 to vector<8x32xf32>
    %64 = arith.addf %63, %62 : vector<8x32xf32>
    %65 = arith.mulf %26, %64 : vector<8x32xf32>
    %cst_33 = arith.constant 0.70721358 : f32
    %66 = vector.broadcast %cst_33 : f32 to vector<8x32xf32>
    %67 = arith.mulf %65, %66 : vector<8x32xf32>
    %c0_34 = arith.constant 0 : index
    %c0_35 = arith.constant 0 : index
    %68 = vector.load %arg8[%c0_34, %c0_35] : memref<32x32xf32, #tpu.memory_space<vmem>>, vector<32x32xf32>
    %cst_36 = arith.constant dense<0.000000e+00> : vector<8x32xf32>
    %69 = tpu.matmul %67, %68, %cst_36 {dimension_numbers = #tpu.dot_dimension_numbers<[1], [0], [0], [1], [0, 0, 1, 1], [], []>} : vector<8x32xf32>, vector<32x32xf32>, vector<8x32xf32> -> vector<8x32xf32>
    %c0_37 = arith.constant 0 : index
    %c0_38 = arith.constant 0 : index
    %70 = vector.load %arg9[%c0_37, %c0_38] : memref<8x32xf32, #tpu.memory_space<vmem>>, vector<8x32xf32>
    %cst_39 = arith.constant dense<0.000000e+00> : vector<8x32xf32>
    %71 = tpu.matmul %0, %70, %cst_39 {dimension_numbers = #tpu.dot_dimension_numbers<[1], [0], [0], [1], [0, 0, 1, 1], [], []>} : vector<8x8xf32>, vector<8x32xf32>, vector<8x32xf32> -> vector<8x32xf32>
    %72 = arith.addf %69, %71 : vector<8x32xf32>
    %c1 = arith.constant 1 : index
    %c0_40 = arith.constant 0 : index
    %73 = vector.load %arg7[%c1, %c0_40] : memref<3x32xf32, #tpu.memory_space<vmem>>, vector<1x32xf32>
    %74 = vector.broadcast %73 : vector<1x32xf32> to vector<8x32xf32>
    %75 = arith.addf %72, %74 : vector<8x32xf32>
    %cst_41 = arith.constant 5.000000e-01 : f32
    %76 = vector.broadcast %cst_41 : f32 to vector<8x32xf32>
    %77 = arith.mulf %76, %75 : vector<8x32xf32>
    %cst_42 = arith.constant 0.707106769 : f32
    %78 = vector.broadcast %cst_42 : f32 to vector<8x32xf32>
    %79 = arith.mulf %75, %78 : vector<8x32xf32>
    %cst_43 = arith.constant 0.000000e+00 : f32
    %80 = vector.broadcast %cst_43 : f32 to vector<8x32xf32>
    %81 = arith.cmpf oge, %79, %80 : vector<8x32xf32>
    %cst_44 = arith.constant 1.000000e+00 : f32
    %cst_45 = arith.constant -1.000000e+00 : f32
    %82 = vector.broadcast %cst_44 : f32 to vector<8x32xf32>
    %83 = vector.broadcast %cst_45 : f32 to vector<8x32xf32>
    %84 = arith.select %81, %82, %83 : vector<8x32xi1>, vector<8x32xf32>
    %85 = math.absf %79 : vector<8x32xf32>
    %cst_46 = arith.constant 0.327591091 : f32
    %86 = vector.broadcast %cst_46 : f32 to vector<8x32xf32>
    %87 = arith.mulf %86, %85 : vector<8x32xf32>
    %cst_47 = arith.constant 1.000000e+00 : f32
    %88 = vector.broadcast %cst_47 : f32 to vector<8x32xf32>
    %89 = arith.addf %88, %87 : vector<8x32xf32>
    %cst_48 = arith.constant 1.000000e+00 : f32
    %90 = vector.broadcast %cst_48 : f32 to vector<8x32xf32>
    %91 = arith.divf %90, %89 : vector<8x32xf32>
    %cst_49 = arith.constant 1.06140542 : f32
    %92 = vector.broadcast %cst_49 : f32 to vector<8x32xf32>
    %93 = arith.mulf %91, %92 : vector<8x32xf32>
    %cst_50 = arith.constant -1.45315206 : f32
    %94 = vector.broadcast %cst_50 : f32 to vector<8x32xf32>
    %95 = arith.addf %94, %93 : vector<8x32xf32>
    %96 = arith.mulf %91, %95 : vector<8x32xf32>
    %cst_51 = arith.constant 1.42141378 : f32
    %97 = vector.broadcast %cst_51 : f32 to vector<8x32xf32>
    %98 = arith.addf %97, %96 : vector<8x32xf32>
    %99 = arith.mulf %91, %98 : vector<8x32xf32>
    %cst_52 = arith.constant -0.284496725 : f32
    %100 = vector.broadcast %cst_52 : f32 to vector<8x32xf32>
    %101 = arith.addf %100, %99 : vector<8x32xf32>
    %102 = arith.mulf %91, %101 : vector<8x32xf32>
    %cst_53 = arith.constant 0.254829586 : f32
    %103 = vector.broadcast %cst_53 : f32 to vector<8x32xf32>
    %104 = arith.addf %103, %102 : vector<8x32xf32>
    %105 = arith.mulf %91, %104 : vector<8x32xf32>
    %cst_54 = arith.constant 0.000000e+00 : f32
    %106 = vector.broadcast %cst_54 : f32 to vector<8x32xf32>
    %107 = arith.subf %106, %85 : vector<8x32xf32>
    %108 = arith.mulf %107, %85 : vector<8x32xf32>
    %109 = math.exp %108 : vector<8x32xf32>
    %110 = arith.mulf %105, %109 : vector<8x32xf32>
    %cst_55 = arith.constant 1.000000e+00 : f32
    %111 = vector.broadcast %cst_55 : f32 to vector<8x32xf32>
    %112 = arith.subf %111, %110 : vector<8x32xf32>
    %113 = arith.mulf %84, %112 : vector<8x32xf32>
    %cst_56 = arith.constant 1.000000e+00 : f32
    %114 = vector.broadcast %cst_56 : f32 to vector<8x32xf32>
    %115 = arith.addf %114, %113 : vector<8x32xf32>
    %116 = arith.mulf %77, %115 : vector<8x32xf32>
    %117 = arith.addf %116, %67 : vector<8x32xf32>
    %cst_57 = arith.constant 0.70721358 : f32
    %118 = vector.broadcast %cst_57 : f32 to vector<8x32xf32>
    %119 = arith.mulf %117, %118 : vector<8x32xf32>
    %c0_58 = arith.constant 0 : index
    %c0_59 = arith.constant 0 : index
    %120 = vector.load %arg10[%c0_58, %c0_59] : memref<32x32xf32, #tpu.memory_space<vmem>>, vector<32x32xf32>
    %cst_60 = arith.constant dense<0.000000e+00> : vector<8x32xf32>
    %121 = tpu.matmul %119, %120, %cst_60 {dimension_numbers = #tpu.dot_dimension_numbers<[1], [0], [0], [1], [0, 0, 1, 1], [], []>} : vector<8x32xf32>, vector<32x32xf32>, vector<8x32xf32> -> vector<8x32xf32>
    %c0_61 = arith.constant 0 : index
    %c0_62 = arith.constant 0 : index
    %122 = vector.load %arg11[%c0_61, %c0_62] : memref<8x32xf32, #tpu.memory_space<vmem>>, vector<8x32xf32>
    %cst_63 = arith.constant dense<0.000000e+00> : vector<8x32xf32>
    %123 = tpu.matmul %0, %122, %cst_63 {dimension_numbers = #tpu.dot_dimension_numbers<[1], [0], [0], [1], [0, 0, 1, 1], [], []>} : vector<8x8xf32>, vector<8x32xf32>, vector<8x32xf32> -> vector<8x32xf32>
    %124 = arith.addf %121, %123 : vector<8x32xf32>
    %c2 = arith.constant 2 : index
    %c0_64 = arith.constant 0 : index
    %125 = vector.load %arg7[%c2, %c0_64] : memref<3x32xf32, #tpu.memory_space<vmem>>, vector<1x32xf32>
    %126 = vector.broadcast %125 : vector<1x32xf32> to vector<8x32xf32>
    %127 = arith.addf %124, %126 : vector<8x32xf32>
    %cst_65 = arith.constant 5.000000e-01 : f32
    %128 = vector.broadcast %cst_65 : f32 to vector<8x32xf32>
    %129 = arith.mulf %128, %127 : vector<8x32xf32>
    %cst_66 = arith.constant 0.707106769 : f32
    %130 = vector.broadcast %cst_66 : f32 to vector<8x32xf32>
    %131 = arith.mulf %127, %130 : vector<8x32xf32>
    %cst_67 = arith.constant 0.000000e+00 : f32
    %132 = vector.broadcast %cst_67 : f32 to vector<8x32xf32>
    %133 = arith.cmpf oge, %131, %132 : vector<8x32xf32>
    %cst_68 = arith.constant 1.000000e+00 : f32
    %cst_69 = arith.constant -1.000000e+00 : f32
    %134 = vector.broadcast %cst_68 : f32 to vector<8x32xf32>
    %135 = vector.broadcast %cst_69 : f32 to vector<8x32xf32>
    %136 = arith.select %133, %134, %135 : vector<8x32xi1>, vector<8x32xf32>
    %137 = math.absf %131 : vector<8x32xf32>
    %cst_70 = arith.constant 0.327591091 : f32
    %138 = vector.broadcast %cst_70 : f32 to vector<8x32xf32>
    %139 = arith.mulf %138, %137 : vector<8x32xf32>
    %cst_71 = arith.constant 1.000000e+00 : f32
    %140 = vector.broadcast %cst_71 : f32 to vector<8x32xf32>
    %141 = arith.addf %140, %139 : vector<8x32xf32>
    %cst_72 = arith.constant 1.000000e+00 : f32
    %142 = vector.broadcast %cst_72 : f32 to vector<8x32xf32>
    %143 = arith.divf %142, %141 : vector<8x32xf32>
    %cst_73 = arith.constant 1.06140542 : f32
    %144 = vector.broadcast %cst_73 : f32 to vector<8x32xf32>
    %145 = arith.mulf %143, %144 : vector<8x32xf32>
    %cst_74 = arith.constant -1.45315206 : f32
    %146 = vector.broadcast %cst_74 : f32 to vector<8x32xf32>
    %147 = arith.addf %146, %145 : vector<8x32xf32>
    %148 = arith.mulf %143, %147 : vector<8x32xf32>
    %cst_75 = arith.constant 1.42141378 : f32
    %149 = vector.broadcast %cst_75 : f32 to vector<8x32xf32>
    %150 = arith.addf %149, %148 : vector<8x32xf32>
    %151 = arith.mulf %143, %150 : vector<8x32xf32>
    %cst_76 = arith.constant -0.284496725 : f32
    %152 = vector.broadcast %cst_76 : f32 to vector<8x32xf32>
    %153 = arith.addf %152, %151 : vector<8x32xf32>
    %154 = arith.mulf %143, %153 : vector<8x32xf32>
    %cst_77 = arith.constant 0.254829586 : f32
    %155 = vector.broadcast %cst_77 : f32 to vector<8x32xf32>
    %156 = arith.addf %155, %154 : vector<8x32xf32>
    %157 = arith.mulf %143, %156 : vector<8x32xf32>
    %cst_78 = arith.constant 0.000000e+00 : f32
    %158 = vector.broadcast %cst_78 : f32 to vector<8x32xf32>
    %159 = arith.subf %158, %137 : vector<8x32xf32>
    %160 = arith.mulf %159, %137 : vector<8x32xf32>
    %161 = math.exp %160 : vector<8x32xf32>
    %162 = arith.mulf %157, %161 : vector<8x32xf32>
    %cst_79 = arith.constant 1.000000e+00 : f32
    %163 = vector.broadcast %cst_79 : f32 to vector<8x32xf32>
    %164 = arith.subf %163, %162 : vector<8x32xf32>
    %165 = arith.mulf %136, %164 : vector<8x32xf32>
    %cst_80 = arith.constant 1.000000e+00 : f32
    %166 = vector.broadcast %cst_80 : f32 to vector<8x32xf32>
    %167 = arith.addf %166, %165 : vector<8x32xf32>
    %168 = arith.mulf %129, %167 : vector<8x32xf32>
    %169 = arith.addf %168, %119 : vector<8x32xf32>
    %c0_81 = arith.constant 0 : index
    %c0_82 = arith.constant 0 : index
    %170 = vector.load %arg12[%c0_81, %c0_82] : memref<32x128xf32, #tpu.memory_space<vmem>>, vector<32x128xf32>
    %cst_83 = arith.constant dense<0.000000e+00> : vector<8x128xf32>
    %171 = tpu.matmul %169, %170, %cst_83 {dimension_numbers = #tpu.dot_dimension_numbers<[1], [0], [0], [1], [0, 0, 1, 1], [], []>} : vector<8x32xf32>, vector<32x128xf32>, vector<8x128xf32> -> vector<8x128xf32>
    %c0_84 = arith.constant 0 : index
    %c0_85 = arith.constant 0 : index
    %172 = vector.load %arg13[%c0_84, %c0_85] : memref<8x128xf32, #tpu.memory_space<vmem>>, vector<8x128xf32>
    %cst_86 = arith.constant dense<0.000000e+00> : vector<8x128xf32>
    %173 = tpu.matmul %0, %172, %cst_86 {dimension_numbers = #tpu.dot_dimension_numbers<[1], [0], [0], [1], [0, 0, 1, 1], [], []>} : vector<8x8xf32>, vector<8x128xf32>, vector<8x128xf32> -> vector<8x128xf32>
    %174 = arith.addf %171, %173 : vector<8x128xf32>
    %c0_87 = arith.constant 0 : index
    %c0_88 = arith.constant 0 : index
    %175 = vector.load %arg14[%c0_87, %c0_88] : memref<1x128xf32, #tpu.memory_space<vmem>>, vector<1x128xf32>
    %176 = vector.broadcast %175 : vector<1x128xf32> to vector<8x128xf32>
    %177 = arith.addf %174, %176 : vector<8x128xf32>
    %c0_89 = arith.constant 0 : index
    %c0_90 = arith.constant 0 : index
    %178 = vector.load %arg15[%c0_89, %c0_90] : memref<8x128xf32, #tpu.memory_space<vmem>>, vector<8x128xf32>
    tpu.vector_store %arg15[%c0_89, %c0_90], %177 {strides = array<i32>} : memref<8x128xf32, #tpu.memory_space<vmem>>, vector<8x128xf32>,
    return
  }
  func.func @transform_0(%arg0: i32) -> (i32, i32) {
    %c0_i32 = arith.constant 0 : i32
    %c0_i32_0 = arith.constant 0 : i32
    return %arg0, %c0_i32 : i32, i32
  }
  func.func @transform_1(%arg0: i32) -> (i32, i32) {
    %c0_i32 = arith.constant 0 : i32
    %c0_i32_0 = arith.constant 0 : i32
    %c0_i32_1 = arith.constant 0 : i32
    return %c0_i32, %c0_i32_0 : i32, i32
  }
  func.func @transform_2(%arg0: i32) -> (i32, i32) {
    %c0_i32 = arith.constant 0 : i32
    %c0_i32_0 = arith.constant 0 : i32
    %c0_i32_1 = arith.constant 0 : i32
    return %c0_i32, %c0_i32_0 : i32, i32
  }
  func.func @transform_3(%arg0: i32) -> (i32, i32) {
    %c0_i32 = arith.constant 0 : i32
    %c0_i32_0 = arith.constant 0 : i32
    %c0_i32_1 = arith.constant 0 : i32
    return %c0_i32, %c0_i32_0 : i32, i32
  }
  func.func @transform_4(%arg0: i32) -> (i32, i32) {
    %c0_i32 = arith.constant 0 : i32
    %c0_i32_0 = arith.constant 0 : i32
    %c0_i32_1 = arith.constant 0 : i32
    return %c0_i32, %c0_i32_0 : i32, i32
  }
  func.func @transform_5(%arg0: i32) -> (i32, i32) {
    %c0_i32 = arith.constant 0 : i32
    %c0_i32_0 = arith.constant 0 : i32
    %c0_i32_1 = arith.constant 0 : i32
    return %c0_i32, %c0_i32_0 : i32, i32
  }
  func.func @transform_6(%arg0: i32) -> (i32, i32) {
    %c0_i32 = arith.constant 0 : i32
    %c0_i32_0 = arith.constant 0 : i32
    %c0_i32_1 = arith.constant 0 : i32
    return %c0_i32, %c0_i32_0 : i32, i32
  }
  func.func @transform_7(%arg0: i32) -> (i32, i32) {
    %c0_i32 = arith.constant 0 : i32
    %c0_i32_0 = arith.constant 0 : i32
    %c0_i32_1 = arith.constant 0 : i32
    return %c0_i32, %c0_i32_0 : i32, i32
  }
  func.func @transform_8(%arg0: i32) -> (i32, i32) {
    %c0_i32 = arith.constant 0 : i32
    %c0_i32_0 = arith.constant 0 : i32
    %c0_i32_1 = arith.constant 0 : i32
    return %c0_i32, %c0_i32_0 : i32, i32
  }
  func.func @transform_9(%arg0: i32) -> (i32, i32) {
    %c0_i32 = arith.constant 0 : i32
    %c0_i32_0 = arith.constant 0 : i32
    %c0_i32_1 = arith.constant 0 : i32
    return %c0_i32, %c0_i32_0 : i32, i32
  }
  func.func @transform_10(%arg0: i32) -> (i32, i32) {
    %c0_i32 = arith.constant 0 : i32
    %c0_i32_0 = arith.constant 0 : i32
    %c0_i32_1 = arith.constant 0 : i32
    return %c0_i32, %c0_i32_0 : i32, i32
  }
  func.func @transform_11(%arg0: i32) -> (i32, i32) {
    %c0_i32 = arith.constant 0 : i32
    %c0_i32_0 = arith.constant 0 : i32
    %c0_i32_1 = arith.constant 0 : i32
    return %c0_i32, %c0_i32_0 : i32, i32
  }
  func.func @transform_12(%arg0: i32) -> (i32, i32) {
    %c0_i32 = arith.constant 0 : i32
    %c0_i32_0 = arith.constant 0 : i32
    %c0_i32_1 = arith.constant 0 : i32
    return %c0_i32, %c0_i32_0 : i32, i32
  }
  func.func @transform_13(%arg0: i32) -> (i32, i32) {
    %c0_i32 = arith.constant 0 : i32
    %c0_i32_0 = arith.constant 0 : i32
    %c0_i32_1 = arith.constant 0 : i32
    return %c0_i32, %c0_i32_0 : i32, i32
  }
  func.func @transform_14(%arg0: i32) -> (i32, i32) {
    %c0_i32 = arith.constant 0 : i32
    %c0_i32_0 = arith.constant 0 : i32
    return %arg0, %c0_i32 : i32, i32
  }
}

</mosaic_0001>

<bundles_post_ra>
// kernel: tpu_custom_call.1
= control target key start
LH: loop header
LB: loop body
LE: loop exit
PB: predicated region body
PF: predicated region fallthrough
CT: control target
= control target key end

     0   :  { %s2673_s0 = inlined_call_operand.vmem [shape: f32[16,8], index: 0, kind: input, shape index: {}]   ;;  %s2674_s1 = inlined_call_operand.hbm [shape: f32[8,64], index: 1, kind: input, shape index: {}]   ;;  %s2675_s2 = inlined_call_operand.vmem [shape: f32[1,64], index: 2, kind: input, shape index: {}]   ;;  %s2676_s3 = inlined_call_operand.hbm [shape: f32[1,32], index: 3, kind: input, shape index: {}]   ;;  %s2677_s4 = inlined_call_operand.vmem [shape: f32[64,32], index: 4, kind: input, shape index: {}]   ;;  %s2678_s5 = inlined_call_operand.vmem [shape: f32[32,32], index: 5, kind: input, shape index: {}]   ;;  %s2679_s6 = inlined_call_operand.hbm [shape: f32[3,32], index: 6, kind: input, shape index: {}]   ;;  %s2680_s7 = inlined_call_operand.vmem [shape: f32[32,32], index: 7, kind: input, shape index: {}]   ;;  %s2681_s8 = inlined_call_operand.hbm [shape: f32[8,32], index: 8, kind: input, shape index: {}]   ;;  %s2682_s9 = inlined_call_operand.vmem [shape: f32[32,32], index: 9, kind: input, shape index: {}]   ;;  %s2683_s10 = inlined_call_operand.hbm [shape: f32[8,32], index: 10, kind: input, shape index: {}]   ;;  %s2684_s11 = inlined_call_operand.vmem [shape: f32[32,128], index: 11, kind: input, shape index: {}]   ;;  %s2685_s12 = inlined_call_operand.hbm [shape: f32[8,128], index: 12, kind: input, shape index: {}]   ;;  %s2686_s13 = inlined_call_operand.vmem [shape: f32[1,128], index: 13, kind: input, shape index: {}]   ;;  %s2687_s14 = inlined_call_operand.hbm [shape: f32[16,128], index: 14, kind: output, shape index: {}]  }
   0x1   :  { %2698 = sst [smem:[#allocation25_spill]] %s2676_s3 }
   0x2   :  { %2699 = sst [smem:[#allocation26_spill]] %s2686_s13 }
   0x3   :  { %2700 = sst [smem:[#allocation27_spill]] %s2687_s14 }
   0x4   :  { %19 = vsyncpa [#allocation3], 0 }
   0x5   :  { %20 = vsyncpa [#allocation6], 0 }
   0x6   :  { %21 = vsyncpa [#allocation9], 0 }
   0x7   :  { %22 = vsyncpa [#allocation12], 0 }
   0x8   :  { %23 = vsyncpa [#allocation4], 0 }
   0x9   :  { %25 = vsyncpa [#allocation4 + $0x1], 0  ;;  %s2260_s29 = smov 0   ;;  %s2262_s30 = smov 0  }
   0xa   :  { %s2264_s15 = smov 0   ;;  %s2266_s16 = smov 0  }
   0xb LB: > { %2701 = sst [smem:[#allocation19_spill]] %s2153_s29  ;;  %s2281_s17 = sadd.s32 4294967295, %s2165_s16   ;;  %s2165_s16 = sphi %s2266_s16, %s2729_s16   ;;  %s2161_s15 = sphi %s2264_s15, %s2731_s15   ;;  %s2157_s30 = sphi %s2262_s30, %s2733_s30   ;;  %s2153_s29 = sphi %s2260_s29, %s2732_s29  }
   0xc   : > { %2702 = sst [smem:[#allocation20_spill]] %s2161_s15  ;;  %s1590_s18 = sadd.s32 4294967294, %s2165_s16  }
   0xd   : > { %2703 = sst [smem:[#allocation21_spill]] %s2165_s16  ;;  %s2285_s19 = sadd.s32 1, %s2165_s16  }
   0xe   : > { %2704 = sst [smem:[#allocation22_spill]] %s2285_s19  ;;  %s337_s20 = sadd.s32 1, %s2161_s15 }
   0xf   : > { %s334_s21 = ssub.s32 %s2165_s16, %s2285_s19  ;;  %p347_p0 = scmp.ne.s32.totalorder %s2161_s15, %s2157_s30 }
  0x10   : > { %p335_p1 = scmp.eq.s32.totalorder %s334_s21, 0  ;;  %p348_p2 = scmp.eq.s32.totalorder %s2281_s17, 1 }
  0x11   : > { %p353_p3 = scmp.ne.s32.totalorder %s2157_s30, %s2153_s29  ;;  %p354_p4 = scmp.eq.s32.totalorder %s1590_s18, 1 }
  0x12   : > { %s2296_s22 = scalar_select %p335_p1, %s2161_s15, %s337_s20  }
  0x13   : > { %p2298_p5 = por %p348_p2, %p347_p0  ;;  %p2302_p6 = por %p354_p4, %p353_p3 }
  0x14   : > { %2705 = sst [smem:[#allocation23_spill]] %s2296_s22  ;;  %p1591_p7 = scmp.ge.s32.totalorder %s2165_s16, 1 }
  0x15   : > { %s2706_s23 = scalar_select %p2298_p5, 1, 0 }
  0x16   : > { %s2707_s24 = scalar_select %p2302_p6, 1, 0 }
  0x17   : > { %p361_p8 = scmp.lt.s32.totalorder %s2165_s16, 3  ;;  %p2694_p9 = scmp.eq.s32.totalorder %s2281_s17, 0 }
  0x18   : > { %2708 = sst [smem:[#allocation24_spill]] %s2707_s24  ;;  %s2167_s26 = smov [#allocation5]  }
  0x19   : > { %p2309_p10 = pnand %p1591_p7, %p361_p8  ;;  %s388_s27 = sshll.u32 %s2167_s26, 4  ;;  %s389_s27 = int_to_ptr.vmem [resolvable:$true] %s388_s27 }
  0x1a   : > { %s2168_s28 = smov [#allocation8]   ;;  %s2169_s21 = smov [#allocation2]  }
  0x1b   : > { %s2709_s25 = scalar_select %p2309_p10, 1, 0 }
  0x1c   : > { %p1817_p11 = pneg %p2309_p10  ;;  %s419_s18 = sshll.u32 %s2168_s28, 4  ;;  %s2321_s18 = int_to_ptr.vmem [resolvable:$true] %s419_s18 }
  0x1d   : > { %s374_s22 = sshll.u32 %s2169_s21, 4  ;;  %s2711_s3 = sld [smem:[#allocation25_spill]]  ;;  %s2323_s22 = int_to_ptr.vmem [resolvable:$true] %s374_s22 }
  0x1e   : > { %p2317_p12 = pnand %p2694_p9, %p1817_p11 }
  0x20   : > { %p2333_p0 = pneg %p2317_p12 }
  0x23   : > { %s1919_s26 = scalar_lea.hbm %s2711_s3, 16 }
  0x24   : > { %p1920_p13 = scmp.ne.s32.totalorder %s2711_s3, %s1919_s26  ;;  %p1926_p3 = scmp.lt.u32.totalorder %s1919_s26, %s2711_s3 }
  0x26   : > { %p1922_p1 = pnand %p2333_p0, %p1920_p13 }
  0x28   : > { %p1923_p2 = pneg %p1922_p1 }
  0x2a   : > { %p1928_p4 = pnand %p1926_p3, %p1923_p2 }
  0x2c   : > { %1931 = shalt.err (!%p1928_p4)
}
  0x2d   : > { %s1932_s15 = scalar_lea.vmem %s389_s27, 16  ;;  %s1939_s29 = scalar_lea.vmem %s389_s27, 32 }
  0x2e   : > { %p1933_p7 = scmp.ne.s32.totalorder %s389_s27, %s1932_s15  ;;  %p1940_p9 = scmp.lt.s32.totalorder %s389_s27, %s389_s27 }
  0x2f   : > { %p1941_p6 = scmp.lt.s32.totalorder %s1939_s29, %s1932_s15 }
  0x30   : > { %p1935_p8 = pnand %p1933_p7, %p2333_p0 }
  0x31   : > { %p1942_p5 = por %p1941_p6, %p1940_p9 }
  0x32   : > { %p1936_p11 = pneg %p1935_p8 }
  0x34   : > { %p1943_p10 = pnand %p1942_p5, %p1936_p11 }
  0x36   : > { %1946 = shalt.err (!%p1943_p10)
}
  0x37   : > { %1823 = dma.hbm_to_vmem [thread:$0]  (!%p2317_p12), %s2711_s3, 16, %s389_s27, [#allocation6]  }
  0x38   : > { %s1947_s21 = scalar_lea.hbm %s2681_s8, 128 }
  0x39   : > { %p1948_p13 = scmp.ne.s32.totalorder %s2681_s8, %s1947_s21  ;;  %p1954_p5 = scmp.lt.u32.totalorder %s1947_s21, %s2681_s8 }
  0x3b   : > { %p1950_p1 = pnand %p1948_p13, %p2333_p0 }
  0x3d   : > { %p1951_p6 = pneg %p1950_p1 }
  0x3f   : > { %p1956_p9 = pnand %p1954_p5, %p1951_p6 }
  0x41   : > { %1959 = shalt.err (!%p1956_p9)
}
  0x42   : > { %s1960_s27 = scalar_lea.vmem %s2321_s18, 128  ;;  %p1968_p4 = scmp.lt.s32.totalorder %s2321_s18, %s2321_s18 }
  0x43   : > { %p1961_p10 = scmp.ne.s32.totalorder %s2321_s18, %s1960_s27  ;;  %p1969_p7 = scmp.lt.s32.totalorder %s1960_s27, %s1960_s27 }
  0x45   : > { %p1963_p2 = pnand %p1961_p10, %p2333_p0  ;;  %p1970_p8 = por %p1969_p7, %p1968_p4 }
  0x47   : > { %p1964_p3 = pneg %p1963_p2 }
  0x49   : > { %p1971_p11 = pnand %p1970_p8, %p1964_p3 }
  0x4b   : > { %1974 = shalt.err (!%p1971_p11)
}
  0x4c   : > { %1829 = dma.hbm_to_vmem [thread:$0]  (!%p2317_p12), %s2681_s8, 128, %s2321_s18, [#allocation9]  }
  0x4d   : > { %s1975_s16 = scalar_lea.hbm %s2674_s1, 128 }
  0x4e   : > { %p1976_p13 = scmp.ne.s32.totalorder %s2674_s1, %s1975_s16  ;;  %p1982_p5 = scmp.lt.u32.totalorder %s1975_s16, %s2674_s1 }
  0x50   : > { %p1978_p1 = pnand %p1976_p13, %p2333_p0 }
  0x52   : > { %p1979_p6 = pneg %p1978_p1 }
  0x54   : > { %p1984_p9 = pnand %p1982_p5, %p1979_p6 }
  0x56   : > { %1987 = shalt.err (!%p1984_p9)
}
  0x57   : > { %s1988_s18 = scalar_lea.vmem %s2323_s22, 128  ;;  %p1996_p4 = scmp.lt.s32.totalorder %s2323_s22, %s2323_s22 }
  0x58   : > { %p1989_p10 = scmp.ne.s32.totalorder %s2323_s22, %s1988_s18  ;;  %p1997_p7 = scmp.lt.s32.totalorder %s1988_s18, %s1988_s18 }
  0x5a   : > { %p1991_p2 = pnand %p1989_p10, %p2333_p0  ;;  %p1998_p8 = por %p1997_p7, %p1996_p4 }
  0x5c   : > { %p1992_p3 = pneg %p1991_p2 }
  0x5e   : > { %p1999_p11 = pnand %p1998_p8, %p1992_p3 }
  0x60   : > { %2002 = shalt.err (!%p1999_p11)
}
  0x61   : > { %1820 = dma.hbm_to_vmem [thread:$0]  (!%p2317_p12), %s2674_s1, 128, %s2323_s22, [#allocation3]  }
  0x62   : > { %s2170_s14 = smov [#allocation7]   ;;  %s2171_s24 = smov [#allocation10]  }
  0x63   : > { %s405_s19 = sshll.u32 %s2170_s14, 4  ;;  %s433_s16 = sshll.u32 %s2171_s24, 4  ;;  %s406_s19 = int_to_ptr.vmem [resolvable:$true] %s405_s19  ;;  %s434_s16 = int_to_ptr.vmem [resolvable:$true] %s433_s16 }
  0x64   : > { %s2003_s15 = scalar_lea.hbm %s2679_s6, 64 }
  0x65   : > { %p2004_p13 = scmp.ne.s32.totalorder %s2679_s6, %s2003_s15  ;;  %p2010_p5 = scmp.lt.u32.totalorder %s2003_s15, %s2679_s6 }
  0x67   : > { %p2006_p1 = pnand %p2004_p13, %p2333_p0 }
  0x69   : > { %p2007_p6 = pneg %p2006_p1 }
  0x6b   : > { %p2012_p9 = pnand %p2010_p5, %p2007_p6 }
  0x6d   : > { %2015 = shalt.err (!%p2012_p9)
}
  0x6e   : > { %s2016_s22 = scalar_lea.vmem %s406_s19, 64  ;;  %p2024_p4 = scmp.lt.s32.totalorder %s406_s19, %s406_s19 }
  0x6f   : > { %p2017_p10 = scmp.ne.s32.totalorder %s406_s19, %s2016_s22  ;;  %p2025_p7 = scmp.lt.s32.totalorder %s2016_s22, %s2016_s22 }
  0x71   : > { %p2019_p2 = pnand %p2017_p10, %p2333_p0  ;;  %p2026_p8 = por %p2025_p7, %p2024_p4 }
  0x73   : > { %p2020_p3 = pneg %p2019_p2 }
  0x75   : > { %p2027_p11 = pnand %p2026_p8, %p2020_p3 }
  0x77   : > { %2030 = shalt.err (!%p2027_p11)
}
  0x78   : > { %1826 = dma.hbm_to_vmem [thread:$0]  (!%p2317_p12), %s2679_s6, 64, %s406_s19, [#allocation6]  }
  0x79   : > { %s2031_s26 = scalar_lea.hbm %s2683_s10, 128 }
  0x7a   : > { %p2032_p13 = scmp.ne.s32.totalorder %s2683_s10, %s2031_s26  ;;  %p2038_p5 = scmp.lt.u32.totalorder %s2031_s26, %s2683_s10 }
  0x7c   : > { %p2034_p1 = pnand %p2032_p13, %p2333_p0 }
  0x7e   : > { %p2035_p6 = pneg %p2034_p1 }
  0x80   : > { %p2040_p9 = pnand %p2038_p5, %p2035_p6 }
  0x82   : > { %2043 = shalt.err (!%p2040_p9)
}
  0x83   : > { %s2044_s27 = scalar_lea.vmem %s434_s16, 128  ;;  %p2052_p4 = scmp.lt.s32.totalorder %s434_s16, %s434_s16 }
  0x84   : > { %p2045_p10 = scmp.ne.s32.totalorder %s434_s16, %s2044_s27  ;;  %p2053_p7 = scmp.lt.s32.totalorder %s2044_s27, %s2044_s27 }
  0x86   : > { %p2047_p2 = pnand %p2045_p10, %p2333_p0  ;;  %p2054_p8 = por %p2053_p7, %p2052_p4 }
  0x88   : > { %p2048_p3 = pneg %p2047_p2 }
  0x8a   : > { %p2055_p11 = pnand %p2054_p8, %p2048_p3 }
  0x8c   : > { %2058 = shalt.err (!%p2055_p11)
}
  0x8d   : > { %1832 = dma.hbm_to_vmem [thread:$0]  (!%p2317_p12), %s2683_s10, 128, %s434_s16, [#allocation9]  }
  0x8e   : > { %s2172_s13 = smov [#allocation11]   ;;  %s2059_s26 = scalar_lea.hbm %s2685_s12, 128 }
  0x8f   : > { %s447_s14 = sshll.u32 %s2172_s13, 4  ;;  %p2060_p13 = scmp.ne.s32.totalorder %s2685_s12, %s2059_s26  ;;  %s448_s14 = int_to_ptr.vmem [resolvable:$true] %s447_s14 }
  0x90   : > { %p2066_p5 = scmp.lt.u32.totalorder %s2059_s26, %s2685_s12 }
  0x91   : > { %p2062_p1 = pnand %p2060_p13, %p2333_p0 }
  0x93   : > { %p2063_p6 = pneg %p2062_p1 }
  0x95   : > { %p2068_p9 = pnand %p2066_p5, %p2063_p6 }
  0x97   : > { %2071 = shalt.err (!%p2068_p9)
}
  0x98   : > { %s2072_s16 = scalar_lea.vmem %s448_s14, 128  ;;  %p2080_p4 = scmp.lt.s32.totalorder %s448_s14, %s448_s14 }
  0x99   : > { %p2073_p10 = scmp.ne.s32.totalorder %s448_s14, %s2072_s16  ;;  %p2081_p7 = scmp.lt.s32.totalorder %s2072_s16, %s2072_s16 }
  0x9b   : > { %p2075_p2 = pnand %p2073_p10, %p2333_p0  ;;  %p2082_p8 = por %p2081_p7, %p2080_p4 }
  0x9d   : > { %p2076_p3 = pneg %p2075_p2 }
  0x9f   : > { %p2083_p11 = pnand %p2082_p8, %p2076_p3 }
  0xa1   : > { %2086 = shalt.err (!%p2083_p11)
}
  0xa2   : > { %1835 = dma.hbm_to_vmem [thread:$0]  (!%p2317_p12), %s2685_s12, 128, %s448_s14, [#allocation12]  }
  0xa3   : > { %p2713_p13 = scmp.ne.s32.totalorder %s2709_s25, 0 }
  0xa4   : > { %p2714_p1 = scmp.eq.s32.totalorder (!%p2713_p13), %s2281_s17, 0 }
  0xa5   : > { %470 = sbr.rel (%p2713_p13) target bundleno = 1434 (0x59a), region = 76 }
  0xac   : > { %2132 = dma.done.wait (%p2714_p1), [#allocation3], 128   ;;  %p2715_p0 = pmov %p2714_p1 }
  0xae   : > { %2134 = vsyncadd (%p2715_p0), [#allocation3], 4294967168  ;;  %p2716_p6 = pmov %p2715_p0 }
  0xaf   : > { %p2717_p5 = pmov %p2715_p0 }
  0xb0   : > { %2136 = dma.done.wait (%p2716_p6), [#allocation6], 80  }
  0xb1   : > { %2138 = vsyncadd (%p2717_p5), [#allocation6], 4294967216  ;;  %p2718_p9 = pmov %p2715_p0 }
  0xb2   : > { %p2719_p12 = pmov %p2715_p0 }
  0xb3   : > { %2140 = dma.done.wait (%p2718_p9), [#allocation9], 256  }
  0xb4   : > { %2142 = vsyncadd (%p2719_p12), [#allocation9], 4294967040  ;;  %p2720_p10 = pmov %p2715_p0 }
  0xb5   : > { %p2721_p2 = pmov %p2715_p0 }
  0xb6   : > { %2144 = dma.done.wait (%p2720_p10), [#allocation12], 128  }
  0xb7   : > { %2146 = vsyncadd (%p2721_p2), [#allocation12], 4294967168  ;;  %p535_p3 = scmp.lt.s32.totalorder %s2281_s17, 1  ;;  %v2173_v0 = vmov 7   ;;  %v2174_v1 = vmov 0.0   ;;  %vm2175_vm0 = vmmov 0  }
  0xb8   : > { %1902 = vset.pattern.permute.xlu0 %v2173_v0  ;;  %1668 = vmatprep.subr.mxu1 %v2174_v1  ;;  %vm548_vm1 = vcmask 64512   ;;  %v540_v2 = vld [vmem:[#allocation2] sm:$0xff]  ;;  %v749_v4 = vld [vmem:[%s2678_s5] sm:$0xff]  ;;  %v750_v5 = vld [vmem:[%s2678_s5 + $0x8] sm:$0xff]  ;;  %v2176_v7 = vmov 0.0|0.0   ;;  %vm753_vm14 = vcmask 261120  }
  0xb9   : > { %1670 = vmatprep.mubr.msk.f32.mxu1 %vm2175_vm0, %v2174_v1  ;;  %s536_s25 = scalar_select %p535_p3, %s2281_s17, 1  ;;  %1700 = vmatprep.mubr.msk.f32.mxu0 %vm2175_vm0, %v2174_v1  ;;  %v741_v6 = vld [vmem:[%s2677_s4] sm:$0xff]  ;;  %v1752_v8 = vpack.c.bf16 %v750_v5, %v749_v4  ;;  %v742_v9 = vld [vmem:[%s2677_s4 + $0x8] sm:$0xff]  ;;  %v751_v10 = vld [vmem:[%s2678_s5 + $0x10] sm:$0xff]  ;;  %v2177_v36 = vmov 683565275  }
  0xba   : > { %1669 = vmatpush3.msra.mxu1 %v540_v2  ;;  %1757 = vmatprep.subr.bf16.mxu0 %v2176_v7  ;;  %v752_v11 = vld [vmem:[%s2678_s5 + $0x18] sm:$0xff]  ;;  %v1758_v12 = vpack.c.bf16 %v742_v9, %v741_v6  ;;  %v743_v13 = vld [vmem:[%s2677_s4 + $0x10] sm:$0xff]  ;;  %v745_v17 = vld [vmem:[%s2677_s4 + $0x20] sm:$0xff]  ;;  %v2178_v38 = vmov 2475754826   ;;  %s532_s24 = sand.u32 1, %s2157_s30  }
  0xbb   : > { %s1607_s20 = sshll.u32 %s536_s25, 3  ;;  %1751 = vmatprep.subr.bf16.mxu1 %v2176_v7  ;;  %v744_v14 = vld [vmem:[%s2677_s4 + $0x18] sm:$0xff]  ;;  %v1755_v15 = vpack.c.bf16 %v752_v11, %v751_v10  ;;  %v746_v18 = vld [vmem:[%s2677_s4 + $0x28] sm:$0xff]  ;;  %v747_v20 = vld [vmem:[%s2677_s4 + $0x30] sm:$0xff]  ;;  %v2179_v40 = vmov 2131351028  }
  0xbc   : > { %s538_s13 = scalar_lea.vmem %s2673_s0, %s1607_s20  ;;  %1759 = vmatpush3.bf16.msra.mxu0 %v1758_v12  ;;  %v1761_v16 = vpack.c.bf16 %v744_v14, %v743_v13  ;;  %v1764_v19 = vpack.c.bf16 %v746_v18, %v745_v17  ;;  %v748_v21 = vld [vmem:[%s2677_s4 + $0x38] sm:$0xff]  ;;  %v2180_v42 = vmov 2102212464   ;;  %v2181_v44 = vmov 920167782   ;;  %s1606_s26 = sshll.u32 %s532_s24, 3 }
  0xbd   : > { %v2477_v3 = vld [vmem:[%s538_s13] sm:$0xff]  ;;  %1760 = vmatprep.subr.bf16.mxu0 %v2176_v7  ;;  %v1767_v22 = vpack.c.bf16 %v748_v21, %v747_v20  ;;  %v1610_v23 = vld [vmem:[#allocation5] ss:$0 sm:$0xff]  ;;  %v2182_v50 = vmov 1326507024   ;;  %s2722_s29 = sld [smem:[#allocation26_spill]] }
  0xbe   : > { %627 = vperm.xlu0 %1902, %v2477_v3   ;;  %1671 = vmatmul.mubr.msk.f32.vlgmr.msra.gmra.mrb[0].mxu1 %vm548_vm1, %v2477_v3  ;;  %s1628_s18 = sshll.u32 %s2281_s17, 7  ;;  %s534_s16 = scalar_lea.vmem [#allocation13], %s1606_s26 }
  0xbf   : > { %1681 = vmatprep.mubr.msk.f32.mxu1 %vm2175_vm0, %v2174_v1  ;;  %1753 = vmatpush3.bf16.msra.mxu1 %v1752_v8  ;;  %s1471_s27 = sshll.u32 %s534_s16, 4  ;;  %s2723_s20 = sld [smem:[#allocation27_spill]]  ;;  %s2633_s27 = int_to_ptr.vmem [resolvable:$true] %s1471_s27 }
  0xc0   : > { %1754 = vmatprep.subr.bf16.mxu1 %v2176_v7  ;;  %1762 = vmatpush3.bf16.msra.mxu0 %v1761_v16  ;;  %s1458_s22 = scalar_lea.sflag [#allocation4], %s532_s24  ;;  %s2087_s13 = scalar_lea.vmem %s2633_s27, 128 }
  0xc1   : > { %1763 = vmatprep.subr.bf16.mxu0 %v2176_v7  ;;  %p2088_p4 = scmp.ne.s32.totalorder %s2633_s27, %s2087_s13  ;;  %p2724_p7 = scmp.ne.s32.totalorder %s2706_s23, 0 }
  0xc2   : > { %s2184_s17 = smov [#allocation13]  }
  0xc3   : > { %1756 = vmatpush3.bf16.msra.mxu1 %v1755_v15  ;;  %p2089_p8 = pnand %p2088_p4, %p2724_p7  ;;  %s2091_s14 = sshll.u32 %s2184_s17, 4  ;;  %s2092_s14 = int_to_ptr.vmem [resolvable:$false] %s2091_s14 }
  0xc4   : > { %1703 = vmatprep.subr.mxu1 %v2174_v1  ;;  %1765 = vmatpush3.bf16.msra.mxu0 %v1764_v19  ;;  %s2093_s3 = scalar_lea.vmem %s2092_s14, 256  ;;  %p2094_p13 = scmp.lt.s32.totalorder %s2633_s27, %s2092_s14 }
  0xc5   : > { %1766 = vmatprep.subr.bf16.mxu0 %v2176_v7  ;;  %s2631_s28 = scalar_lea.hbm %s2723_s20, %s1628_s18  ;;  %p2090_p11 = pneg %p2089_p8 }
  0xc6   : > { %p2095_p1 = scmp.lt.s32.totalorder %s2093_s3, %s2087_s13 }
  0xc8   : > { %1768 = vmatpush3.bf16.msra.mxu0 %v1767_v22  ;;  %p2096_p0 = por %p2095_p1, %p2094_p13 }
  0xc9   : > { %1719 = vmatprep.subr.mxu0 %v2174_v1 }
  0xca   : > { %p2097_p6 = pnand %p2096_p0, %p2090_p11 }
 0x13d   : > { %v628_v24 = vpop.permute.xlu0 %627 }
 0x13e   : > { %v2528_v25 = vmul.f32 %v1610_v23, %v628_v24 }
 0x140   : > { %v640_v26 = vand.u32 2139095040, %v2528_v25  ;;  %v637_v30 = vand.u32 2147483647, %v2528_v25  ;;  %vm639_vm9 = vcmp.lt.s32.totalorder %v2528_v25, 0  ;;  %vm729_vm15 = vweird.f32 %v2528_v25 }
 0x142   : > { %v641_v27 = vshrl.u32 %v640_v26, 23  ;;  %v644_v33 = vand.u32 8388607, %v637_v30  ;;  %vm638_vm10 = vcmp.le.f32.partialorder %v637_v30, 0.7853982 }
 0x144   : > { %v1611_v28 = vadd.s32 4294967169, %v641_v27  ;;  %v645_v52 = vor.u32 8388608, %v644_v33 }
 0x146   : > { %v647_v29 = vadd.s32 1, %v1611_v28  ;;  %v685_v4 = vshll.u32 %v645_v52, 8 }
 0x148   : > { %vm648_vm2 = vcmp.gt.s32.totalorder %v647_v29, 0 }
 0x149   : > { %v649_v31 = vsel %vm648_vm2, %v647_v29, 0 }
 0x14a   : > { %v651_v32 = vand.u32 31, %v649_v31  ;;  %v650_v34 = vshrl.u32 %v649_v31, 5 }
 0x14c   : > { %v652_v35 = vsub.s32 32, %v651_v32  ;;  %v654_v37 = vshll.u32 %v2177_v36, %v651_v32  ;;  %v657_v39 = vshll.u32 %v2178_v38, %v651_v32  ;;  %v660_v41 = vshll.u32 %v2179_v40, %v651_v32 }
 0x14d   : > { %v663_v43 = vshll.u32 %v2180_v42, %v651_v32  ;;  %v666_v45 = vshll.u32 %v2181_v44, %v651_v32  ;;  %vm669_vm3 = vcmp.lt.s32.totalorder %v650_v34, 1  ;;  %vm672_vm4 = vcmp.lt.s32.totalorder %v650_v34, 4 }
 0x14e   : > { %v655_v46 = vshrl.u32 %v2178_v38, %v652_v35  ;;  %v658_v47 = vshrl.u32 %v2179_v40, %v652_v35  ;;  %v661_v48 = vshrl.u32 %v2180_v42, %v652_v35  ;;  %v664_v49 = vshrl.u32 %v2181_v44, %v652_v35 }
 0x14f   : > { %v667_v51 = vshrl.u32 %v2182_v50, %v652_v35  ;;  %v653_v56 = vshrl.u32 %v2177_v36, %v652_v35  ;;  %vm671_vm5 = vcmp.lt.s32.totalorder %v650_v34, 3  ;;  %vm670_vm6 = vcmp.lt.s32.totalorder %v650_v34, 2 }
 0x150   : > { %v656_v53 = vor.u32 %v655_v46, %v654_v37  ;;  %v659_v54 = vor.u32 %v658_v47, %v657_v39  ;;  %v662_v55 = vor.u32 %v661_v48, %v660_v41  ;;  %v665_v57 = vor.u32 %v664_v49, %v663_v43 }
 0x151   : > { %v668_v58 = vor.u32 %v667_v51, %v666_v45 }
 0x152   : > { %v674_v59 = vsel %vm672_vm4, %v662_v55, 2102212464  ;;  %v677_v60 = vsel %vm669_vm3, %v656_v53, %v659_v54  ;;  %v681_v61 = vsel %vm669_vm3, %v659_v54, %v662_v55  ;;  %v678_v62 = vsel %vm672_vm4, %v665_v57, 920167782 }
 0x153   : > { %v682_v63 = vsel %vm672_vm4, %v668_v58, 1326507024  ;;  %v679_v0 = vsel %vm671_vm5, %v662_v55, %v678_v62  ;;  %v673_v5 = vsel %vm669_vm3, %v653_v56, %v656_v53  ;;  %v675_v6 = vsel %vm671_vm5, %v659_v54, %v674_v59  ;;  %v1608_v56 = vld [vmem:[%s2675_s2] ss:$0 sm:$0xff] }
 0x154   : > { %v683_v2 = vsel %vm671_vm5, %v665_v57, %v682_v63  ;;  %v680_v8 = vsel %vm670_vm6, %v677_v60, %v679_v0  ;;  %v676_v14 = vsel %vm670_vm6, %v673_v5, %v675_v6  ;;  %vm827_vm3 = vcmask 523264   ;;  %v935_v63 = vld [vmem:[%s2680_s7] sm:$0xff]  ;;  %v936_v0 = vld [vmem:[%s2680_s7 + $0x8] sm:$0xff]  ;;  %v938_v5 = vld [vmem:[%s2680_s7 + $0x18] sm:$0xff] }
 0x155   : > { %v684_v9 = vsel %vm670_vm6, %v681_v61, %v683_v2  ;;  %v2540_v12 = vmul.u32.u64.low %v685_v4, %v680_v8  ;;  %v2541_v13 = vmul.u32.u64.high %v685_v4, %v680_v8, %v2540_v12  ;;  %v692_v16 = vmul.u32 %v685_v4, %v676_v14 }
 0x156   : > { %v2537_v10 = vmul.u32.u64.low %v685_v4, %v684_v9  ;;  %v2538_v11 = vmul.u32.u64.high %v685_v4, %v684_v9, %v2537_v10  ;;  %v1770_v2 = vpack.c.bf16 %v936_v0, %v935_v63  ;;  %v937_v4 = vld [vmem:[%s2680_s7 + $0x10] sm:$0xff] }
 0x157   : > { %v695_v15 = vadd.s32 1, %v2541_v13  ;;  %v1773_v6 = vpack.c.bf16 %v938_v5, %v937_v4 }
 0x158   : > { %vm694_vm7 = vc.u32 %v2538_v11, %v2540_v12  ;;  %v693_v29 = vadd.s32 %v2540_v12, %v2538_v11  ;;  %v1617_v11 = vld [vmem:[#allocation7] ss:$0 sm:$0xff] }
 0x159   : > { %v696_v17 = vsel %vm694_vm7, %v695_v15, %v2541_v13 }
 0x15a   : > { %v697_v18 = vadd.s32 %v696_v17, %v692_v16 }
 0x15c   : > { %v698_v19 = vadd.s32 536870912, %v697_v18 }
 0x15e   : > { %v699_v20 = vshrl.u32 %v698_v19, 30 }
 0x160   : > { %v700_v21 = vshll.u32 %v699_v20, 30  ;;  %v723_v42 = vsub.s32 4, %v699_v20 }
 0x162   : > { %v701_v22 = vsub.s32 %v697_v18, %v700_v21  ;;  %v724_v45 = vsel %vm639_vm9, %v723_v42, %v699_v20 }
 0x163   : > { %v726_v47 = vsel %vm638_vm10, 0, %v724_v45 }
 0x164   : > { %v703_v23 = vsub.s32 0, %v701_v22  ;;  %v730_v48 = vadd.s32 3, %v726_v47  ;;  %v1119_v47 = vld [vmem:[%s2682_s9 + $0x8] sm:$0xff] }
 0x166   : > { %v1612_v24 = vmin.u32 %v703_v23, %v701_v22  ;;  %v731_v49 = vand.u32 3, %v730_v48 }
 0x168   : > { %v705_v26 = vclz %v1612_v24  ;;  %vm736_vm11 = vcmp.eq.s32.totalorder %v731_v49, 2  ;;  %vm733_vm12 = vcmp.eq.s32.totalorder %v731_v49, 0  ;;  %vm732_vm13 = vcmp.lt.s32.totalorder %v731_v49, 2  ;;  %v1120_v49 = vld [vmem:[%s2682_s9 + $0x10] sm:$0xff] }
 0x16a   : > { %v1613_v27 = vadd.s32 4294967294, %v705_v26 }
 0x16c   : > { %vm1614_vm8 = vcmp.lt.s32.totalorder %v1613_v27, 0 }
 0x16d   : > { %v708_v28 = vsel %vm1614_vm8, 0, %v1613_v27 }
 0x16e   : > { %v709_v31 = vsub.s32 32, %v708_v28  ;;  %v713_v32 = vsub.s32 4294967266, %v708_v28  ;;  %v710_v33 = vshll.u32 %v701_v22, %v708_v28 }
 0x170   : > { %v711_v34 = vshrl.u32 %v693_v29, %v709_v31  ;;  %v714_v35 = vadd.s32 127, %v713_v32 }
 0x172   : > { %v712_v36 = vor.u32 %v711_v34, %v710_v33  ;;  %v715_v37 = vshll.u32 %v714_v35, 23 }
 0x174   : > { %v716_v38 = vor.u32 4788187, %v715_v37  ;;  %v719_v40 = vcvt.s32.f32 %v712_v36  ;;  %v2183_v37 = vmov -1.0  }
 0x176   : > { %v717_v39 = vand.u32 2147483647, %v716_v38 }
 0x178   : > { %v720_v41 = vmul.f32 %v719_v40, %v717_v39 }
 0x17a   : > { %v721_v43 = vxor.u32 2147483648, %v720_v41 }
 0x17c   : > { %v722_v44 = vsel %vm639_vm9, %v721_v43, %v720_v41 }
 0x17d   : > { %v725_v46 = vsel %vm638_vm10, %v2528_v25, %v722_v44  ;;  %v939_v25 = vld [vmem:[#allocation8] sm:$0xff] }
 0x17e   : > { %1903 = vcosq.f32 %v725_v46 }
 0x17f   : > { %1905 = vsinq.f32 %v725_v46  ;;  %v1118_v46 = vld [vmem:[%s2682_s9] sm:$0xff] }
 0x180   : > { %v1776_v48 = vpack.c.bf16 %v1119_v47, %v1118_v46 }
 0x188   : > { %v1904_v50 = vpop.eup %1903 }
 0x189   : > { %v1906_v51 = vpop.eup %1905  ;;  %v737_v52 = vxor.u32 2147483648, %v1904_v50 }
 0x18a   : > { %v734_v53 = vxor.u32 2147483648, %v1906_v51 }
 0x18b   : > { %v738_v54 = vsel %vm736_vm11, %v737_v52, %v1906_v51  ;;  %v1122_v52 = vld [vmem:[#allocation10] sm:$0xff] }
 0x18c   : > { %v735_v55 = vsel %vm733_vm12, %v1904_v50, %v734_v53  ;;  %v1121_v50 = vld [vmem:[%s2682_s9 + $0x18] sm:$0xff] }
 0x18d   : > { %v739_v30 = vsel %vm732_vm13, %v735_v55, %v738_v54  ;;  %v1779_v51 = vpack.c.bf16 %v1121_v50, %v1120_v49  ;;  %v1620_v54 = vld [vmem:[#allocation7 + $0x1] ss:$0 sm:$0xff] }
 0x18e   : > { %v740_v57 = vsel %vm729_vm15, nan, %v739_v30 }
 0x18f   : > { %1682 = vmatmul.mubr.msk.f32.vlgmr.msra.gmra.mrb[2].mxu1 %vm753_vm14, %v740_v57 }
 0x190   : > { %1705 = vmatprep.mubr.msk.f32.mxu1 %vm2175_vm0, %v2174_v1  ;;  %1704 = vmatpush3.msra.mxu1 %v939_v25 }
 0x191   : > { %v618_v58 = vpop.f32.mrb[0].mxu1  ;;  %1769 = vmatprep.subr.bf16.mxu1 %v2176_v7 }
 0x192   : > { %v619_v59 = vadd.f32 %v1608_v56, %v618_v58  ;;  %v1672_v60 = vpop.f32.mrb[1].mxu1 }
 0x193   : > { %1706 = vmatmul.mubr.msk.f32.vlgmr.msra.gmra.mrb[4].mxu1 %vm548_vm1, %v2477_v3 }
 0x194   : > { %vm622_vm2 = vcmp.ge.f32.partialorder %v619_v59, 0.0  ;;  %v623_v61 = vmul.f32 0.01, %v619_v59  ;;  %1771 = vmatpush3.bf16.msra.mxu1 %v1770_v2  ;;  %1716 = vmatprep.mubr.msk.f32.mxu1 %vm2175_vm0, %v2174_v1 }
 0x195   : > { %1772 = vmatprep.subr.bf16.mxu1 %v2176_v7 }
 0x196   : > { %v624_v62 = vsel %vm622_vm2, %v619_v59, %v623_v61 }
 0x197   : > { %1701 = vmatmul.mubr.msk.f32.vlgmr.msra.gmra.mrb[0].mxu0 %vm827_vm3, %v624_v62 }
 0x198   : > { %1721 = vmatprep.mubr.msk.f32.mxu0 %vm2175_vm0, %v2174_v1  ;;  %1774 = vmatpush3.bf16.msra.mxu1 %v1773_v6 }
 0x199   : > { %1775 = vmatprep.subr.bf16.mxu1 %v2176_v7  ;;  %1720 = vmatpush3.msra.mxu0 %v1122_v52 }
 0x19a   : > { %1735 = vmatprep.subr.mxu0 %v2174_v1 }
 0x19b   : > { %1722 = vmatmul.mubr.msk.f32.vlgmr.msra.gmra.mrb[2].mxu0 %vm548_vm1, %v2477_v3 }
 0x19c   : > { %1737 = vmatprep.mubr.msk.f32.mxu0 %vm2175_vm0, %v2174_v1 }
 0x262   : > { %v823_v8 = vpop.f32.mrb[2].mxu1 }
 0x263   : > { %v1683_v9 = vpop.f32.mrb[3].mxu1 }
 0x266   : > { %v1006_v44 = vpop.f32.mrb[4].mxu1 }
 0x267   : > { %v1707_v45 = vpop.f32.mrb[5].mxu1 }
 0x26a   : > { %v897_v10 = vpop.f32.mrb[0].mxu0 }
 0x26b   : > { %v898_v12 = vadd.f32 %v897_v10, %v823_v8  ;;  %v1702_v13 = vpop.f32.mrb[1].mxu0 }
 0x26d   : > { %v906_v14 = vadd.f32 %v1617_v11, %v898_v12 }
 0x26f   : > { %v908_v15 = vmul.f32 0.70710677, %v906_v14  ;;  %v907_v40 = vmul.f32 0.5, %v906_v14 }
 0x271   : > { %v911_v16 = vand.u32 2147483647, %v908_v15  ;;  %vm909_vm4 = vcmp.ge.f32.partialorder %v908_v15, 0.0 }
 0x272   : > { %v910_v38 = vsel %vm909_vm4, 1.0, %v2183_v37 }
 0x273   : > { %v912_v17 = vmul.f32 0.3275911, %v911_v16  ;;  %v925_v19 = vsub.f32 0.0, %v911_v16 }
 0x275   : > { %v913_v18 = vadd.f32 1.0, %v912_v17  ;;  %v926_v21 = vmul.f32 %v925_v19, %v911_v16 }
 0x277   : > { %1907 = vrcp.f32 %v913_v18  ;;  %v927_v24 = vmul.f32 1.442695, %v926_v21 }
 0x279   : > { %1909 = vpow2.f32 %v927_v24  ;;  %v1304_v24 = vld [vmem:[#allocation11] sm:$0xff] }
 0x27a   : > { %1736 = vmatpush3.msra.mxu0 %v1304_v24 }
 0x27b   : > { %1738 = vmatmul.mubr.msk.f32.vlgmr.msra.gmra.mrb[4].mxu0 %vm548_vm1, %v2477_v3  ;;  %1781 = vmatprep.subr.bf16.mxu0 %v2176_v7  ;;  %v1623_v3 = vld [vmem:[#allocation7 + $0x2] ss:$0 sm:$0xff] }
 0x27c   : > { %1748 = vmatprep.mubr.msk.f32.mxu0 %vm2175_vm0, %v2174_v1 }
 0x281   : > { %v1908_v20 = vpop.eup %1907 }
 0x282   : > { %v916_v22 = vmul.f32 1.0614054, %v1908_v20 }
 0x283   : > { %v1910_v34 = vpop.eup %1909 }
 0x284   : > { %v917_v23 = vadd.f32 -1.4531521, %v916_v22  ;;  %v1189_v22 = vpop.f32.mrb[2].mxu0 }
 0x286   : > { %v918_v26 = vmul.f32 %v1908_v20, %v917_v23  ;;  %v1723_v23 = vpop.f32.mrb[3].mxu0 }
 0x288   : > { %v919_v27 = vadd.f32 1.4214138, %v918_v26  ;;  %v1300_v26 = vld [vmem:[%s2684_s11] sm:$0xff] }
 0x28a   : > { %v920_v28 = vmul.f32 %v1908_v20, %v919_v27  ;;  %v1301_v27 = vld [vmem:[%s2684_s11 + $0x8] sm:$0xff] }
 0x28c   : > { %v921_v29 = vadd.f32 -0.28449672, %v920_v28  ;;  %v1782_v28 = vpack.c.bf16 %v1301_v27, %v1300_v26 }
 0x28e   : > { %v922_v31 = vmul.f32 %v1908_v20, %v921_v29  ;;  %1783 = vmatpush3.bf16.msra.mxu0 %v1782_v28  ;;  %v1302_v29 = vld [vmem:[%s2684_s11 + $0x10] sm:$0xff] }
 0x28f   : > { %1784 = vmatprep.subr.bf16.mxu0 %v2176_v7 }
 0x290   : > { %v923_v32 = vadd.f32 0.2548296, %v922_v31  ;;  %v1303_v31 = vld [vmem:[%s2684_s11 + $0x18] sm:$0xff] }
 0x292   : > { %v924_v33 = vmul.f32 %v1908_v20, %v923_v32  ;;  %v1785_v32 = vpack.c.bf16 %v1303_v31, %v1302_v29 }
 0x294   : > { %v929_v35 = vmul.f32 %v1910_v34, %v924_v33  ;;  %1786 = vmatpush3.bf16.msra.mxu0 %v1785_v32 }
 0x296   : > { %v930_v36 = vsub.f32 1.0, %v929_v35 }
 0x298   : > { %v931_v39 = vmul.f32 %v930_v36, %v910_v38 }
 0x29a   : > { %v932_v41 = vadd.f32 1.0, %v931_v39 }
 0x29c   : > { %v933_v42 = vmul.f32 %v932_v41, %v907_v40 }
 0x29e   : > { %v934_v43 = vmul.f32 0.7072136, %v933_v42 }
 0x2a0   : > { %1717 = vmatmul.mubr.msk.f32.vlgmr.msra.gmra.mrb[6].mxu1 %vm753_vm14, %v934_v43 }
 0x2a1   : > { %1732 = vmatprep.mubr.msk.f32.mxu1 %vm2175_vm0, %v2174_v1  ;;  %1777 = vmatpush3.bf16.msra.mxu1 %v1776_v48 }
 0x2a2   : > { %1778 = vmatprep.subr.bf16.mxu1 %v2176_v7 }
 0x2a5   : > { %1780 = vmatpush3.bf16.msra.mxu1 %v1779_v51 }
 0x373   : > { %v1079_v53 = vpop.f32.mrb[6].mxu1 }
 0x374   : > { %v1080_v55 = vadd.f32 %v1079_v53, %v1006_v44  ;;  %v1718_v30 = vpop.f32.mrb[7].mxu1 }
 0x376   : > { %v1088_v56 = vadd.f32 %v1620_v54, %v1080_v55 }
 0x378   : > { %v1090_v57 = vmul.f32 0.70710677, %v1088_v56  ;;  %v1089_v17 = vmul.f32 0.5, %v1088_v56 }
 0x37a   : > { %v1093_v58 = vand.u32 2147483647, %v1090_v57  ;;  %vm1091_vm5 = vcmp.ge.f32.partialorder %v1090_v57, 0.0 }
 0x37b   : > { %v1092_v15 = vsel %vm1091_vm5, 1.0, %v2183_v37 }
 0x37c   : > { %v1094_v59 = vmul.f32 0.3275911, %v1093_v58  ;;  %v1107_v61 = vsub.f32 0.0, %v1093_v58 }
 0x37e   : > { %v1095_v60 = vadd.f32 1.0, %v1094_v59  ;;  %v1108_v25 = vmul.f32 %v1107_v61, %v1093_v58  ;;  %v1371_v61 = vpop.f32.mrb[4].mxu0 }
 0x380   : > { %1911 = vrcp.f32 %v1095_v60  ;;  %v1109_v2 = vmul.f32 1.442695, %v1108_v25 }
 0x382   : > { %1913 = vpow2.f32 %v1109_v2 }
 0x38a   : > { %v1912_v62 = vpop.eup %1911 }
 0x38b   : > { %v1098_v63 = vmul.f32 1.0614054, %v1912_v62 }
 0x38c   : > { %v1914_v12 = vpop.eup %1913 }
 0x38d   : > { %v1099_v0 = vadd.f32 -1.4531521, %v1098_v63  ;;  %v1626_v63 = vld [vmem:[%s2722_s29] ss:$0 sm:$0xff] }
 0x38f   : > { %v1100_v4 = vmul.f32 %v1912_v62, %v1099_v0 }
 0x391   : > { %v1101_v5 = vadd.f32 1.4214138, %v1100_v4 }
 0x393   : > { %v1102_v6 = vmul.f32 %v1912_v62, %v1101_v5 }
 0x395   : > { %v1103_v8 = vadd.f32 -0.28449672, %v1102_v6 }
 0x397   : > { %v1104_v9 = vmul.f32 %v1912_v62, %v1103_v8 }
 0x399   : > { %v1105_v10 = vadd.f32 0.2548296, %v1104_v9 }
 0x39b   : > { %v1106_v11 = vmul.f32 %v1912_v62, %v1105_v10  ;;  %v1739_v62 = vpop.f32.mrb[5].mxu0 }
 0x39d   : > { %v1111_v13 = vmul.f32 %v1914_v12, %v1106_v11 }
 0x39f   : > { %v1112_v14 = vsub.f32 1.0, %v1111_v13 }
 0x3a1   : > { %v1113_v16 = vmul.f32 %v1112_v14, %v1092_v15 }
 0x3a3   : > { %v1114_v18 = vadd.f32 1.0, %v1113_v16 }
 0x3a5   : > { %v1115_v19 = vmul.f32 %v1114_v18, %v1089_v17 }
 0x3a7   : > { %v1116_v20 = vadd.f32 %v1115_v19, %v934_v43 }
 0x3a9   : > { %v1117_v21 = vmul.f32 0.7072136, %v1116_v20 }
 0x3ab   : > { %1733 = vmatmul.mubr.msk.f32.vlgmr.msra.gmra.mrb[8].mxu1 %vm753_vm14, %v1117_v21 }
 0x47e   : > { %v1262_v33 = vpop.f32.mrb[8].mxu1 }
 0x47f   : > { %v1263_v34 = vadd.f32 %v1262_v33, %v1189_v22  ;;  %v1734_v35 = vpop.f32.mrb[9].mxu1 }
 0x481   : > { %v1271_v36 = vadd.f32 %v1623_v3, %v1263_v34 }
 0x483   : > { %v1273_v38 = vmul.f32 0.70710677, %v1271_v36  ;;  %v1272_v57 = vmul.f32 0.5, %v1271_v36 }
 0x485   : > { %v1276_v39 = vand.u32 2147483647, %v1273_v38  ;;  %vm1274_vm0 = vcmp.ge.f32.partialorder %v1273_v38, 0.0 }
 0x486   : > { %v1275_v30 = vsel %vm1274_vm0, 1.0, %v2183_v37 }
 0x487   : > { %v1277_v1 = vmul.f32 0.3275911, %v1276_v39  ;;  %v1290_v7 = vsub.f32 0.0, %v1276_v39 }
 0x489   : > { %v1278_v40 = vadd.f32 1.0, %v1277_v1  ;;  %v1291_v42 = vmul.f32 %v1290_v7, %v1276_v39 }
 0x48b   : > { %1915 = vrcp.f32 %v1278_v40  ;;  %v1292_v45 = vmul.f32 1.442695, %v1291_v42 }
 0x48d   : > { %1917 = vpow2.f32 %v1292_v45 }
 0x495   : > { %v1916_v41 = vpop.eup %1915 }
 0x496   : > { %v1281_v43 = vmul.f32 1.0614054, %v1916_v41 }
 0x497   : > { %v1918_v53 = vpop.eup %1917 }
 0x498   : > { %v1282_v44 = vadd.f32 -1.4531521, %v1281_v43 }
 0x49a   : > { %v1283_v46 = vmul.f32 %v1916_v41, %v1282_v44 }
 0x49c   : > { %v1284_v47 = vadd.f32 1.4214138, %v1283_v46 }
 0x49e   : > { %v1285_v48 = vmul.f32 %v1916_v41, %v1284_v47 }
 0x4a0   : > { %v1286_v49 = vadd.f32 -0.28449672, %v1285_v48 }
 0x4a2   : > { %v1287_v50 = vmul.f32 %v1916_v41, %v1286_v49 }
 0x4a4   : > { %v1288_v51 = vadd.f32 0.2548296, %v1287_v50 }
 0x4a6   : > { %v1289_v52 = vmul.f32 %v1916_v41, %v1288_v51 }
 0x4a8   : > { %v1294_v54 = vmul.f32 %v1918_v53, %v1289_v52 }
 0x4aa   : > { %v1295_v55 = vsub.f32 1.0, %v1294_v54 }
 0x4ac   : > { %v1296_v56 = vmul.f32 %v1295_v55, %v1275_v30 }
 0x4ae   : > { %v1297_v58 = vadd.f32 1.0, %v1296_v56 }
 0x4b0   : > { %v1298_v59 = vmul.f32 %v1297_v58, %v1272_v57 }
 0x4b2   : > { %v1299_v60 = vadd.f32 %v1298_v59, %v1117_v21 }
 0x4b4   : > { %1749 = vmatmul.mubr.msk.f32.vlgmr.msra.gmra.mrb[6].mxu0 %vm753_vm14, %v1299_v60 }
 0x587   : > { %v1444_v25 = vpop.f32.mrb[6].mxu0 }
 0x588   : > { %v1445_v37 = vadd.f32 %v1444_v25, %v1371_v61  ;;  %v1750_v0 = vpop.f32.mrb[7].mxu0 }
 0x58a   : > { %v1455_v2 = vadd.f32 %v1626_v63, %v1445_v37 }
 0x58c   : > { %1456 = vst [vmem:[%s534_s16] sm:$0xff] %v1455_v2 }
 0x58d   : > { %2100 = shalt.err (!%p2097_p6)
}
 0x58e   : > { %s2101_s24 = scalar_lea.hbm %s2631_s28, 128  ;;  %s2105_s15 = scalar_lea.hbm %s2723_s20, 256 }
 0x58f   : > { %p2102_p5 = scmp.ne.s32.totalorder %s2631_s28, %s2101_s24  ;;  %p2106_p10 = scmp.lt.u32.totalorder %s2631_s28, %s2723_s20 }
 0x590   : > { %p2107_p2 = scmp.lt.u32.totalorder %s2105_s15, %s2101_s24  ;;  %p2109_p4 = scmp.lt.u32.totalorder %s2101_s24, %s2631_s28 }
 0x591   : > { %p2103_p9 = pnand %p2102_p5, %p2724_p7 }
 0x592   : > { %p2108_p3 = por %p2107_p2, %p2106_p10 }
 0x593   : > { %p2104_p12 = pneg %p2103_p9 }
 0x594   : > { %p2110_p8 = por %p2109_p4, %p2108_p3 }
 0x596   : > { %p2111_p11 = pnand %p2110_p8, %p2104_p12 }
 0x598   : > { %2114 = shalt.err (!%p2111_p11)
}
 0x599   : > { %1815 = dma.vmem_to_hbm [thread:$0]  (%p2724_p7), %s2633_s27, 128, %s2631_s28, %s1458_s22  }
 0x59a PF: > { %s2725_s16 = sld [smem:[#allocation21_spill]]  ;;  %s2726_s19 = sld [smem:[#allocation19_spill]] }
 0x59b   : > { %s2727_s25 = sld [smem:[#allocation24_spill]] }
 0x5a0   : > { %p1852_p13 = scmp.ge.s32.totalorder %s2725_s16, 2  ;;  %s1483_s13 = sand.u32 1, %s2726_s19  }
 0x5a1   : > { %p2728_p1 = scmp.ne.s32.totalorder %s2727_s25, 0  ;;  %s1484_s17 = scalar_lea.sflag [#allocation4], %s1483_s13 }
 0x5a3   : > { %p1837_p0 = pnand %p1852_p13, %p2728_p1 }
 0x5a5   : > { %2148 = dma.done.wait (!%p1837_p0), %s1484_s17, 128  }
 0x5a6   : > { %2150 = vsyncadd (!%p1837_p0), %s1484_s17, 4294967168  ;;  %s2729_s16 = sld [smem:[#allocation22_spill]]  ;;  %s2730_s14 = sld [smem:[#allocation20_spill]] }
 0x5a7   : > { %s2731_s15 = sld [smem:[#allocation23_spill]]  ;;  %s2732_s29 = smov %s2157_s30 }
 0x5ac   : > { %p28_p6 = scmp.ge.s32.totalorder %s2729_s16, 4   ;;  %s2733_s30 = smov %s2730_s14 }
 0x5ae   :  { %30 = sbr.rel (!%p28_p6) target bundleno = 11 (0xb), region = 136 }
 0x5b5   :  { %1489 = vsyncpa [#allocation3], 1 }
 0x5b6   :  { %1491 = vsyncpa [#allocation3 + $0x1], 1 }
 0x5b7   :  { %1492 = vsyncpa [#allocation6], 1 }
 0x5b8   :  { %1493 = vsyncpa [#allocation9], 1 }
 0x5b9   :  { %1494 = vsyncpa [#allocation12], 1 }
 0x5ba   :  { %1495 = vsyncpa [#allocation4], 1 }
 0x5bb   :  { %1497 = vsyncpa [#allocation4 + $0x1], 1 }

</bundles_post_ra>
